<compile_context>
chip_gen: v7x
topology: tpu7x:2x2x1
jax: 0.10.0
libtpu: 0.0.40
codegen_flags: <defaults>
</compile_context>

<pallas_src>
import functools

import jax
import jax.numpy as jnp
from jax import lax
from jax.experimental import pallas as pl
from jax.experimental.pallas import tpu as pltpu


def _fold_rows_to_8(x):
    """(bt, tile_h, W) -> (8, W) partial sums using only VPU adds.

    tile_h is sublane-aligned (multiple of 8), so the reshape is
    layout-preserving and the reduction runs over a leading (non-sublane,
    non-lane) axis: plain vreg additions, no XLU cross-sublane reduce.
    """
    bt, th, w = x.shape
    return jnp.sum(x.reshape(bt * th // 8, 8, w), axis=0)


def _det_loss_kernel(gt_s_ref, pred_s_ref, ign_ref, gt_geo_ref, pred_geo_ref,
                     out_ref, *, h_total, mask_rows):
    """Per-(batch-block, h-group, h-tile) partial reduction.

    Refs:
      gt_s_ref / pred_s_ref / ign_ref : (bt, tile_h, W)
      gt_geo_ref / pred_geo_ref       : (bt, 5, tile_h, W)
      out_ref (per (b,g) accumulator) : (5, 8, W) rows = [sum_gt,
          sum_pred_masked, intersection, iou*gt, angle*gt], each kept as an
          (8, W) sublane-resident partial.
    """
    g = pl.program_id(1)
    h = pl.program_id(2)
    n_hi = pl.num_programs(2)

    @pl.when(h == 0)
    def _init():
        out_ref[...] = jnp.zeros_like(out_ref)

    f32 = jnp.float32
    gt = gt_s_ref[...].astype(f32)
    ps = pred_s_ref[...].astype(f32)
    ign = ign_ref[...].astype(f32)

    # pred_score * (1 - ignored_map.byte()); the truncating cast is done
    # in-kernel (floor == byte() for the expected non-negative mask in [0, 1]).
    masked_pred = ps * (1.0 - jnp.floor(ign))

    geo_g = gt_geo_ref[...].astype(f32)      # (bt, 5, tile_h, W)
    geo_p = pred_geo_ref[...].astype(f32)
    d1_g, d2_g, d3_g, d4_g, ang_g = (geo_g[:, c] for c in range(5))
    d1_p, d2_p, d3_p, d4_p, ang_p = (geo_p[:, c] for c in range(5))

    area_gt = (d1_g + d2_g) * (d3_g + d4_g)
    area_pred = (d1_p + d2_p) * (d3_p + d4_p)
    w_union = jnp.minimum(d3_g, d3_p) + jnp.minimum(d4_g, d4_p)
    h_union = jnp.minimum(d1_g, d1_p) + jnp.minimum(d2_g, d2_p)
    area_intersect = w_union * h_union
    area_union = area_gt - area_intersect + area_pred
    angle_loss_map = 1.0 - jnp.cos(ang_p - ang_g)

    if mask_rows:
        # Last H-tile may hang off the end of the array: zero those rows.
        # Mask the area terms *before* the log so garbage rows past H can
        # never produce NaN/Inf (log(0+1) = 0); gt/masked_pred masking zeroes
        # the intersection and angle terms transitively.
        tile_h = gt.shape[1]
        row0 = (g * n_hi + h) * tile_h
        rows = lax.broadcasted_iota(jnp.int32, gt.shape, 1) + row0
        valid = rows < h_total
        zero = jnp.zeros_like(gt)
        gt = jnp.where(valid, gt, zero)
        masked_pred = jnp.where(valid, masked_pred, zero)
        area_intersect = jnp.where(valid, area_intersect, zero)
        area_union = jnp.where(valid, area_union, zero)

    iou_loss_map = jnp.log(area_union + 1.0) - jnp.log(area_intersect + 1.0)

    # Sublane-preserving accumulation: full-vreg unmasked read-modify-writes.
    out_ref[0] += _fold_rows_to_8(gt)
    out_ref[1] += _fold_rows_to_8(masked_pred)
    out_ref[2] += _fold_rows_to_8(gt * masked_pred)
    out_ref[3] += _fold_rows_to_8(iou_loss_map * gt)
    out_ref[4] += _fold_rows_to_8(angle_loss_map * gt)


def _vmem_plan():
    """Generation-aware (budget_for_tiling, vmem_limit_bytes)."""
    cap = 128 << 20
    try:
        info = pltpu.get_tpu_info()
        cap = int(getattr(info, "vmem_capacity_bytes", cap))
    except Exception:
        pass
    # ~48 MiB scoped limit on 128-MiB parts (v5e/v6e), ~32 MiB on 64-MiB v7x.
    limit = max(16 << 20, min(cap // 2, 48 << 20))
    budget = (limit * 3) // 4
    return budget, limit


def _plan_tiles(B, H, W, budget_bytes):
    """Pick (bt, tile_h) so 13 double-buffered f32 streams fit the budget."""
    w_pad = ((W + 127) // 128) * 128            # lanes pad to 128 in VMEM
    bytes_per_row = 13 * w_pad * 4              # all channels, one (b, row)
    rows_budget = max(8, budget_bytes // (2 * bytes_per_row))
    rows_budget = min(rows_budget, 4096)        # HBM roofline flat past ~512 rows
    tile_h_full = max(8, ((H + 7) // 8) * 8)    # full-H tile, sublane aligned
    if tile_h_full <= rows_budget:
        tile_h = tile_h_full
        bt_max = max(1, rows_budget // tile_h)
        bt = 1
        for d in range(min(B, bt_max), 0, -1):  # largest divisor of B that fits
            if B % d == 0:
                bt = d
                break
    else:
        bt = 1
        tile_h = max(8, (rows_budget // 8) * 8)
    return bt, tile_h


def detection_loss(gt_score, pred_score, gt_geo, pred_geo, ignored_map,
                   weight_angle=10.0):
    """Mirrors DetectionLoss.forward. NCHW inputs:
       gt_score/pred_score/ignored_map: [B,1,H,W], gt_geo/pred_geo: [B,5,H,W]."""
    B, _, H, W = gt_score.shape

    # Free reshapes only (no transpose, no dtype cast pass over HBM);
    # dtype upcast happens inside the kernel.
    gt_s = gt_score.reshape(B, H, W)
    pred_s = pred_score.reshape(B, H, W)
    ign = ignored_map.reshape(B, H, W)

    budget, vmem_limit = _vmem_plan()
    bt, tile_h = _plan_tiles(B, H, W, budget)

    n_bb = B // bt
    n_h_total = pl.cdiv(H, tile_h)
    # Give the second TensorCore (v7x) something to do when the batch axis
    # alone cannot be split; only use an exact divisor to avoid OOB blocks.
    if n_bb < 2 and n_h_total >= 2 and n_h_total % 2 == 0:
        n_hg = 2
    else:
        n_hg = 1
    n_hi = n_h_total // n_hg
    mask_rows = (tile_h * n_h_total) != H

    kernel = functools.partial(_det_loss_kernel, h_total=H, mask_rows=mask_rows)

    score_spec = pl.BlockSpec((bt, tile_h, W),
                              lambda b, g, h: (b, g * n_hi + h, 0))
    geo_spec = pl.BlockSpec((bt, 5, tile_h, W),
                            lambda b, g, h: (b, 0, g * n_hi + h, 0))
    out_spec = pl.BlockSpec((None, None, 5, 8, W),
                            lambda b, g, h: (b, g, 0, 0, 0))

    partials = pl.pallas_call(
        kernel,
        out_shape=jax.ShapeDtypeStruct((n_bb, n_hg, 5, 8, W), jnp.float32),
        grid=(n_bb, n_hg, n_hi),
        in_specs=[score_spec, score_spec, score_spec, geo_spec, geo_spec],
        out_specs=out_spec,
        compiler_params=pltpu.CompilerParams(
            dimension_semantics=("parallel", "parallel", "arbitrary"),
            vmem_limit_bytes=int(vmem_limit)),
    )(gt_s, pred_s, ign, gt_geo, pred_geo)

    # Tiny epilogue: reduce the packed partials and do the scalar glue.
    sums = jnp.sum(partials, axis=(0, 1, 3, 4))           # (5,)
    sgt, spred, inter, siou, sangle = (sums[i] for i in range(5))

    classify_loss = 1.0 - 2.0 * inter / (sgt + spred + 1e-05)
    safe_gt = jnp.maximum(sgt, 1.0)   # == sgt whenever the valid branch is taken
    angle_loss = sangle / safe_gt
    iou_loss = siou / safe_gt
    geo_loss = weight_angle * angle_loss + iou_loss

    # Early-exit branch of the PyTorch code: sum(gt_score) < 1 -> zeros.
    valid = sgt >= 1.0
    zero = jnp.float32(0.0)
    return (jnp.where(valid, geo_loss, zero),
            jnp.where(valid, classify_loss, zero),
            jnp.where(valid, angle_loss, zero))


def detection_loss_reference(gt_score, pred_score, gt_geo, pred_geo,
                             ignored_map, weight_angle=10.0):
    """Pure-JAX mirror of the PyTorch forward (valid branch)."""
    gt_score = gt_score.astype(jnp.float32)
    masked_pred = (pred_score.astype(jnp.float32)
                   * (1.0 - jnp.floor(ignored_map.astype(jnp.float32))))
    sgt = jnp.sum(gt_score)
    inter = jnp.sum(gt_score * masked_pred)
    union = sgt + jnp.sum(masked_pred) + 1e-05
    classify = 1.0 - 2.0 * inter / union
    g = gt_geo.astype(jnp.float32)
    p = pred_geo.astype(jnp.float32)
    d1g, d2g, d3g, d4g, ag = (g[:, i] for i in range(5))
    d1p, d2p, d3p, d4p, ap = (p[:, i] for i in range(5))
    area_gt = (d1g + d2g) * (d3g + d4g)
    area_pred = (d1p + d2p) * (d3p + d4p)
    w_union = jnp.minimum(d3g, d3p) + jnp.minimum(d4g, d4p)
    h_union = jnp.minimum(d1g, d1p) + jnp.minimum(d2g, d2p)
    area_i = w_union * h_union
    area_u = area_gt - area_i + area_pred
    iou_map = -jnp.log((area_i + 1.0) / (area_u + 1.0))
    ang_map = 1.0 - jnp.cos(ap - ag)
    gs = gt_score[:, 0]
    angle_loss = jnp.sum(ang_map * gs) / sgt
    iou_loss = jnp.sum(iou_map * gs) / sgt
    geo_loss = weight_angle * angle_loss + iou_loss
    return geo_loss, classify, angle_loss


if __name__ == "__main__":
    key = jax.random.PRNGKey(0)
    k1, k2, k3, k4, k5 = jax.random.split(key, 5)
    B, H, W = 2, 16, 16

    gt_score = (jax.random.uniform(k1, (B, 1, H, W)) > 0.5).astype(jnp.float32)
    pred_score = jax.nn.sigmoid(jax.random.normal(k2, (B, 1, H, W))).astype(jnp.float32)
    # geo: 4 distance channels (positive) + 1 angle channel
    dist_gt = jax.random.uniform(k3, (B, 4, H, W), minval=0.0, maxval=10.0)
    ang_gt = jax.random.uniform(k3, (B, 1, H, W), minval=-0.5, maxval=0.5)
    gt_geo = jnp.concatenate([dist_gt, ang_gt], axis=1).astype(jnp.float32)
    dist_pred = jax.random.uniform(k4, (B, 4, H, W), minval=0.0, maxval=10.0)
    ang_pred = jax.random.uniform(k4, (B, 1, H, W), minval=-0.5, maxval=0.5)
    pred_geo = jnp.concatenate([dist_pred, ang_pred], axis=1).astype(jnp.float32)
    ignored_map = (jax.random.uniform(k5, (B, 1, H, W)) > 0.9).astype(jnp.float32)

    loss_fn = jax.jit(detection_loss)
    geo_loss, classify_loss, angle_loss = loss_fn(
        gt_score, pred_score, gt_geo, pred_geo, ignored_map)
    jax.block_until_ready((geo_loss, classify_loss, angle_loss))

    ref = detection_loss_reference(gt_score, pred_score, gt_geo, pred_geo,
                                   ignored_map)
    got = (geo_loss, classify_loss, angle_loss)
    for r, k in zip(ref, got):
        assert jnp.allclose(r, k, rtol=1e-4, atol=1e-4), (r, k)

    print("KERNEL_OK")
</pallas_src>

<mosaic_0001>
module attributes {stable_mosaic.version = 11 : i64} {
  func.func @_det_loss_kernel(%arg0: i32, %arg1: i32, %arg2: i32, %arg3: memref<2x16x16xf32, #tpu.memory_space<vmem>>, %arg4: memref<2x16x16xf32, #tpu.memory_space<vmem>>, %arg5: memref<2x16x16xf32, #tpu.memory_space<vmem>>, %arg6: memref<2x5x16x16xf32, #tpu.memory_space<vmem>>, %arg7: memref<2x5x16x16xf32, #tpu.memory_space<vmem>>, %arg8: memref<1x1x5x8x16xf32, #tpu.memory_space<vmem>>) attributes {dimension_semantics = [#tpu.dimension_semantics<parallel>, #tpu.dimension_semantics<parallel>, #tpu.dimension_semantics<arbitrary>], iteration_bounds = array<i64: 1, 1, 1>, scalar_prefetch = 0 : i64, scratch_operands = 0 : i64, tpu.core_type = #tpu.core_type<tc>, window_params = [{transform_indices = @transform_0, window_bounds = array<i64: 2, 16, 16>}, {transform_indices = @transform_1, window_bounds = array<i64: 2, 16, 16>}, {transform_indices = @transform_2, window_bounds = array<i64: 2, 16, 16>}, {transform_indices = @transform_3, window_bounds = array<i64: 2, 5, 16, 16>}, {transform_indices = @transform_4, window_bounds = array<i64: 2, 5, 16, 16>}, {transform_indices = @transform_5, window_bounds = array<i64: 1, 1, 5, 8, 16>}]} {
    %c0_i32 = arith.constant 0 : i32
    %0 = arith.cmpi eq, %arg2, %c0_i32 : i32
    %1 = arith.extui %0 : i1 to i32
    %c0_i32_0 = arith.constant 0 : i32
    %2 = arith.cmpi ne, %1, %c0_i32_0 : i32
    scf.if %2 {
      %cst_71 = arith.constant 0.000000e+00 : f32
      %101 = vector.broadcast %cst_71 : f32 to vector<5x8x16xf32>
      %c0_72 = arith.constant 0 : index
      %c0_73 = arith.constant 0 : index
      %c0_74 = arith.constant 0 : index
      %c0_75 = arith.constant 0 : index
      %c0_76 = arith.constant 0 : index
      %102 = vector.load %arg8[%c0_72, %c0_73, %c0_74, %c0_75, %c0_76] : memref<1x1x5x8x16xf32, #tpu.memory_space<vmem>>, vector<1x1x5x8x16xf32>
      %103 = vector.shape_cast %102 : vector<1x1x5x8x16xf32> to vector<5x8x16xf32>
      %104 = vector.shape_cast %101 : vector<5x8x16xf32> to vector<1x1x5x8x16xf32>
      tpu.vector_store %arg8[%c0_72, %c0_73, %c0_74, %c0_75, %c0_76], %104 {strides = array<i32>} : memref<1x1x5x8x16xf32, #tpu.memory_space<vmem>>, vector<1x1x5x8x16xf32>,
    } else {
    }
    %c0 = arith.constant 0 : index
    %c0_1 = arith.constant 0 : index
    %c0_2 = arith.constant 0 : index
    %3 = vector.load %arg3[%c0, %c0_1, %c0_2] : memref<2x16x16xf32, #tpu.memory_space<vmem>>, vector<2x16x16xf32>
    %c0_3 = arith.constant 0 : index
    %c0_4 = arith.constant 0 : index
    %c0_5 = arith.constant 0 : index
    %4 = vector.load %arg4[%c0_3, %c0_4, %c0_5] : memref<2x16x16xf32, #tpu.memory_space<vmem>>, vector<2x16x16xf32>
    %c0_6 = arith.constant 0 : index
    %c0_7 = arith.constant 0 : index
    %c0_8 = arith.constant 0 : index
    %5 = vector.load %arg5[%c0_6, %c0_7, %c0_8] : memref<2x16x16xf32, #tpu.memory_space<vmem>>, vector<2x16x16xf32>
    %6 = math.floor %5 : vector<2x16x16xf32>
    %cst = arith.constant 1.000000e+00 : f32
    %7 = vector.broadcast %cst : f32 to vector<2x16x16xf32>
    %8 = arith.subf %7, %6 : vector<2x16x16xf32>
    %9 = arith.mulf %4, %8 : vector<2x16x16xf32>
    %c0_9 = arith.constant 0 : index
    %c0_10 = arith.constant 0 : index
    %c0_11 = arith.constant 0 : index
    %c0_12 = arith.constant 0 : index
    %10 = vector.load %arg6[%c0_9, %c0_10, %c0_11, %c0_12] : memref<2x5x16x16xf32, #tpu.memory_space<vmem>>, vector<2x5x16x16xf32>
    %c0_13 = arith.constant 0 : index
    %c0_14 = arith.constant 0 : index
    %c0_15 = arith.constant 0 : index
    %c0_16 = arith.constant 0 : index
    %11 = vector.load %arg7[%c0_13, %c0_14, %c0_15, %c0_16] : memref<2x5x16x16xf32, #tpu.memory_space<vmem>>, vector<2x5x16x16xf32>
    %12 = vector.extract_strided_slice %10 {offsets = [0, 0, 0, 0], sizes = [2, 1, 16, 16], strides = [1, 1, 1, 1]} : vector<2x5x16x16xf32> to vector<2x1x16x16xf32>
    %13 = vector.shape_cast %12 : vector<2x1x16x16xf32> to vector<2x16x16xf32>
    %14 = vector.extract_strided_slice %10 {offsets = [0, 1, 0, 0], sizes = [2, 1, 16, 16], strides = [1, 1, 1, 1]} : vector<2x5x16x16xf32> to vector<2x1x16x16xf32>
    %15 = vector.shape_cast %14 : vector<2x1x16x16xf32> to vector<2x16x16xf32>
    %16 = vector.extract_strided_slice %10 {offsets = [0, 2, 0, 0], sizes = [2, 1, 16, 16], strides = [1, 1, 1, 1]} : vector<2x5x16x16xf32> to vector<2x1x16x16xf32>
    %17 = vector.shape_cast %16 : vector<2x1x16x16xf32> to vector<2x16x16xf32>
    %18 = vector.extract_strided_slice %10 {offsets = [0, 3, 0, 0], sizes = [2, 1, 16, 16], strides = [1, 1, 1, 1]} : vector<2x5x16x16xf32> to vector<2x1x16x16xf32>
    %19 = vector.shape_cast %18 : vector<2x1x16x16xf32> to vector<2x16x16xf32>
    %20 = vector.extract_strided_slice %10 {offsets = [0, 4, 0, 0], sizes = [2, 1, 16, 16], strides = [1, 1, 1, 1]} : vector<2x5x16x16xf32> to vector<2x1x16x16xf32>
    %21 = vector.shape_cast %20 : vector<2x1x16x16xf32> to vector<2x16x16xf32>
    %22 = vector.extract_strided_slice %11 {offsets = [0, 0, 0, 0], sizes = [2, 1, 16, 16], strides = [1, 1, 1, 1]} : vector<2x5x16x16xf32> to vector<2x1x16x16xf32>
    %23 = vector.shape_cast %22 : vector<2x1x16x16xf32> to vector<2x16x16xf32>
    %24 = vector.extract_strided_slice %11 {offsets = [0, 1, 0, 0], sizes = [2, 1, 16, 16], strides = [1, 1, 1, 1]} : vector<2x5x16x16xf32> to vector<2x1x16x16xf32>
    %25 = vector.shape_cast %24 : vector<2x1x16x16xf32> to vector<2x16x16xf32>
    %26 = vector.extract_strided_slice %11 {offsets = [0, 2, 0, 0], sizes = [2, 1, 16, 16], strides = [1, 1, 1, 1]} : vector<2x5x16x16xf32> to vector<2x1x16x16xf32>
    %27 = vector.shape_cast %26 : vector<2x1x16x16xf32> to vector<2x16x16xf32>
    %28 = vector.extract_strided_slice %11 {offsets = [0, 3, 0, 0], sizes = [2, 1, 16, 16], strides = [1, 1, 1, 1]} : vector<2x5x16x16xf32> to vector<2x1x16x16xf32>
    %29 = vector.shape_cast %28 : vector<2x1x16x16xf32> to vector<2x16x16xf32>
    %30 = vector.extract_strided_slice %11 {offsets = [0, 4, 0, 0], sizes = [2, 1, 16, 16], strides = [1, 1, 1, 1]} : vector<2x5x16x16xf32> to vector<2x1x16x16xf32>
    %31 = vector.shape_cast %30 : vector<2x1x16x16xf32> to vector<2x16x16xf32>
    %32 = arith.addf %13, %15 : vector<2x16x16xf32>
    %33 = arith.addf %17, %19 : vector<2x16x16xf32>
    %34 = arith.mulf %32, %33 : vector<2x16x16xf32>
    %35 = arith.addf %23, %25 : vector<2x16x16xf32>
    %36 = arith.addf %27, %29 : vector<2x16x16xf32>
    %37 = arith.mulf %35, %36 : vector<2x16x16xf32>
    %38 = arith.minimumf %17, %27 : vector<2x16x16xf32>
    %39 = arith.minimumf %19, %29 : vector<2x16x16xf32>
    %40 = arith.addf %38, %39 : vector<2x16x16xf32>
    %41 = arith.minimumf %13, %23 : vector<2x16x16xf32>
    %42 = arith.minimumf %15, %25 : vector<2x16x16xf32>
    %43 = arith.addf %41, %42 : vector<2x16x16xf32>
    %44 = arith.mulf %40, %43 : vector<2x16x16xf32>
    %45 = arith.subf %34, %44 : vector<2x16x16xf32>
    %46 = arith.addf %45, %37 : vector<2x16x16xf32>
    %47 = arith.subf %31, %21 : vector<2x16x16xf32>
    %48 = math.cos %47 : vector<2x16x16xf32>
    %cst_17 = arith.constant 1.000000e+00 : f32
    %49 = vector.broadcast %cst_17 : f32 to vector<2x16x16xf32>
    %50 = arith.subf %49, %48 : vector<2x16x16xf32>
    %cst_18 = arith.constant 1.000000e+00 : f32
    %51 = vector.broadcast %cst_18 : f32 to vector<2x16x16xf32>
    %52 = arith.addf %46, %51 : vector<2x16x16xf32>
    %53 = math.log %52 : vector<2x16x16xf32>
    %cst_19 = arith.constant 1.000000e+00 : f32
    %54 = vector.broadcast %cst_19 : f32 to vector<2x16x16xf32>
    %55 = arith.addf %44, %54 : vector<2x16x16xf32>
    %56 = math.log %55 : vector<2x16x16xf32>
    %57 = arith.subf %53, %56 : vector<2x16x16xf32>
    %c0_20 = arith.constant 0 : index
    %c0_21 = arith.constant 0 : index
    %c0_22 = arith.constant 0 : index
    %c0_23 = arith.constant 0 : index
    %c0_24 = arith.constant 0 : index
    %58 = vector.load %arg8[%c0_20, %c0_21, %c0_22, %c0_23, %c0_24] : memref<1x1x5x8x16xf32, #tpu.memory_space<vmem>>, vector<1x1x1x8x16xf32>
    %59 = vector.shape_cast %58 : vector<1x1x1x8x16xf32> to vector<8x16xf32>
    %60 = vector.shape_cast %3 : vector<2x16x16xf32> to vector<4x8x16xf32>
    %cst_25 = arith.constant dense<0.000000e+00> : vector<8x16xf32>
    %61 = vector.multi_reduction <add>, %60, %cst_25 [0] : vector<4x8x16xf32> to vector<8x16xf32>
    %62 = arith.addf %59, %61 : vector<8x16xf32>
    %c0_26 = arith.constant 0 : index
    %c0_27 = arith.constant 0 : index
    %c0_28 = arith.constant 0 : index
    %c0_29 = arith.constant 0 : index
    %c0_30 = arith.constant 0 : index
    %63 = vector.load %arg8[%c0_26, %c0_27, %c0_28, %c0_29, %c0_30] : memref<1x1x5x8x16xf32, #tpu.memory_space<vmem>>, vector<1x1x1x8x16xf32>
    %64 = vector.shape_cast %63 : vector<1x1x1x8x16xf32> to vector<8x16xf32>
    %65 = vector.shape_cast %62 : vector<8x16xf32> to vector<1x1x1x8x16xf32>
    tpu.vector_store %arg8[%c0_26, %c0_27, %c0_28, %c0_29, %c0_30], %65 {strides = array<i32>} : memref<1x1x5x8x16xf32, #tpu.memory_space<vmem>>, vector<1x1x1x8x16xf32>,
    %c0_31 = arith.constant 0 : index
    %c0_32 = arith.constant 0 : index
    %c1 = arith.constant 1 : index
    %c0_33 = arith.constant 0 : index
    %c0_34 = arith.constant 0 : index
    %66 = vector.load %arg8[%c0_31, %c0_32, %c1, %c0_33, %c0_34] : memref<1x1x5x8x16xf32, #tpu.memory_space<vmem>>, vector<1x1x1x8x16xf32>
    %67 = vector.shape_cast %66 : vector<1x1x1x8x16xf32> to vector<8x16xf32>
    %68 = vector.shape_cast %9 : vector<2x16x16xf32> to vector<4x8x16xf32>
    %cst_35 = arith.constant dense<0.000000e+00> : vector<8x16xf32>
    %69 = vector.multi_reduction <add>, %68, %cst_35 [0] : vector<4x8x16xf32> to vector<8x16xf32>
    %70 = arith.addf %67, %69 : vector<8x16xf32>
    %c0_36 = arith.constant 0 : index
    %c0_37 = arith.constant 0 : index
    %c1_38 = arith.constant 1 : index
    %c0_39 = arith.constant 0 : index
    %c0_40 = arith.constant 0 : index
    %71 = vector.load %arg8[%c0_36, %c0_37, %c1_38, %c0_39, %c0_40] : memref<1x1x5x8x16xf32, #tpu.memory_space<vmem>>, vector<1x1x1x8x16xf32>
    %72 = vector.shape_cast %71 : vector<1x1x1x8x16xf32> to vector<8x16xf32>
    %73 = vector.shape_cast %70 : vector<8x16xf32> to vector<1x1x1x8x16xf32>
    tpu.vector_store %arg8[%c0_36, %c0_37, %c1_38, %c0_39, %c0_40], %73 {strides = array<i32>} : memref<1x1x5x8x16xf32, #tpu.memory_space<vmem>>, vector<1x1x1x8x16xf32>,
    %c0_41 = arith.constant 0 : index
    %c0_42 = arith.constant 0 : index
    %c2 = arith.constant 2 : index
    %c0_43 = arith.constant 0 : index
    %c0_44 = arith.constant 0 : index
    %74 = vector.load %arg8[%c0_41, %c0_42, %c2, %c0_43, %c0_44] : memref<1x1x5x8x16xf32, #tpu.memory_space<vmem>>, vector<1x1x1x8x16xf32>
    %75 = vector.shape_cast %74 : vector<1x1x1x8x16xf32> to vector<8x16xf32>
    %76 = arith.mulf %3, %9 : vector<2x16x16xf32>
    %77 = vector.shape_cast %76 : vector<2x16x16xf32> to vector<4x8x16xf32>
    %cst_45 = arith.constant dense<0.000000e+00> : vector<8x16xf32>
    %78 = vector.multi_reduction <add>, %77, %cst_45 [0] : vector<4x8x16xf32> to vector<8x16xf32>
    %79 = arith.addf %75, %78 : vector<8x16xf32>
    %c0_46 = arith.constant 0 : index
    %c0_47 = arith.constant 0 : index
    %c2_48 = arith.constant 2 : index
    %c0_49 = arith.constant 0 : index
    %c0_50 = arith.constant 0 : index
    %80 = vector.load %arg8[%c0_46, %c0_47, %c2_48, %c0_49, %c0_50] : memref<1x1x5x8x16xf32, #tpu.memory_space<vmem>>, vector<1x1x1x8x16xf32>
    %81 = vector.shape_cast %80 : vector<1x1x1x8x16xf32> to vector<8x16xf32>
    %82 = vector.shape_cast %79 : vector<8x16xf32> to vector<1x1x1x8x16xf32>
    tpu.vector_store %arg8[%c0_46, %c0_47, %c2_48, %c0_49, %c0_50], %82 {strides = array<i32>} : memref<1x1x5x8x16xf32, #tpu.memory_space<vmem>>, vector<1x1x1x8x16xf32>,
    %c0_51 = arith.constant 0 : index
    %c0_52 = arith.constant 0 : index
    %c3 = arith.constant 3 : index
    %c0_53 = arith.constant 0 : index
    %c0_54 = arith.constant 0 : index
    %83 = vector.load %arg8[%c0_51, %c0_52, %c3, %c0_53, %c0_54] : memref<1x1x5x8x16xf32, #tpu.memory_space<vmem>>, vector<1x1x1x8x16xf32>
    %84 = vector.shape_cast %83 : vector<1x1x1x8x16xf32> to vector<8x16xf32>
    %85 = arith.mulf %57, %3 : vector<2x16x16xf32>
    %86 = vector.shape_cast %85 : vector<2x16x16xf32> to vector<4x8x16xf32>
    %cst_55 = arith.constant dense<0.000000e+00> : vector<8x16xf32>
    %87 = vector.multi_reduction <add>, %86, %cst_55 [0] : vector<4x8x16xf32> to vector<8x16xf32>
    %88 = arith.addf %84, %87 : vector<8x16xf32>
    %c0_56 = arith.constant 0 : index
    %c0_57 = arith.constant 0 : index
    %c3_58 = arith.constant 3 : index
    %c0_59 = arith.constant 0 : index
    %c0_60 = arith.constant 0 : index
    %89 = vector.load %arg8[%c0_56, %c0_57, %c3_58, %c0_59, %c0_60] : memref<1x1x5x8x16xf32, #tpu.memory_space<vmem>>, vector<1x1x1x8x16xf32>
    %90 = vector.shape_cast %89 : vector<1x1x1x8x16xf32> to vector<8x16xf32>
    %91 = vector.shape_cast %88 : vector<8x16xf32> to vector<1x1x1x8x16xf32>
    tpu.vector_store %arg8[%c0_56, %c0_57, %c3_58, %c0_59, %c0_60], %91 {strides = array<i32>} : memref<1x1x5x8x16xf32, #tpu.memory_space<vmem>>, vector<1x1x1x8x16xf32>,
    %c0_61 = arith.constant 0 : index
    %c0_62 = arith.constant 0 : index
    %c4 = arith.constant 4 : index
    %c0_63 = arith.constant 0 : index
    %c0_64 = arith.constant 0 : index
    %92 = vector.load %arg8[%c0_61, %c0_62, %c4, %c0_63, %c0_64] : memref<1x1x5x8x16xf32, #tpu.memory_space<vmem>>, vector<1x1x1x8x16xf32>
    %93 = vector.shape_cast %92 : vector<1x1x1x8x16xf32> to vector<8x16xf32>
    %94 = arith.mulf %50, %3 : vector<2x16x16xf32>
    %95 = vector.shape_cast %94 : vector<2x16x16xf32> to vector<4x8x16xf32>
    %cst_65 = arith.constant dense<0.000000e+00> : vector<8x16xf32>
    %96 = vector.multi_reduction <add>, %95, %cst_65 [0] : vector<4x8x16xf32> to vector<8x16xf32>
    %97 = arith.addf %93, %96 : vector<8x16xf32>
    %c0_66 = arith.constant 0 : index
    %c0_67 = arith.constant 0 : index
    %c4_68 = arith.constant 4 : index
    %c0_69 = arith.constant 0 : index
    %c0_70 = arith.constant 0 : index
    %98 = vector.load %arg8[%c0_66, %c0_67, %c4_68, %c0_69, %c0_70] : memref<1x1x5x8x16xf32, #tpu.memory_space<vmem>>, vector<1x1x1x8x16xf32>
    %99 = vector.shape_cast %98 : vector<1x1x1x8x16xf32> to vector<8x16xf32>
    %100 = vector.shape_cast %97 : vector<8x16xf32> to vector<1x1x1x8x16xf32>
    tpu.vector_store %arg8[%c0_66, %c0_67, %c4_68, %c0_69, %c0_70], %100 {strides = array<i32>} : memref<1x1x5x8x16xf32, #tpu.memory_space<vmem>>, vector<1x1x1x8x16xf32>,
    return
  }
  func.func @transform_0(%arg0: i32, %arg1: i32, %arg2: i32) -> (i32, i32, i32) {
    %c1_i32 = arith.constant 1 : i32
    %0 = arith.muli %arg1, %c1_i32 : i32
    %1 = arith.addi %0, %arg2 : i32
    %c0_i32 = arith.constant 0 : i32
    %c0_i32_0 = arith.constant 0 : i32
    return %arg0, %1, %c0_i32 : i32, i32, i32
  }
  func.func @transform_1(%arg0: i32, %arg1: i32, %arg2: i32) -> (i32, i32, i32) {
    %c1_i32 = arith.constant 1 : i32
    %0 = arith.muli %arg1, %c1_i32 : i32
    %1 = arith.addi %0, %arg2 : i32
    %c0_i32 = arith.constant 0 : i32
    %c0_i32_0 = arith.constant 0 : i32
    return %arg0, %1, %c0_i32 : i32, i32, i32
  }
  func.func @transform_2(%arg0: i32, %arg1: i32, %arg2: i32) -> (i32, i32, i32) {
    %c1_i32 = arith.constant 1 : i32
    %0 = arith.muli %arg1, %c1_i32 : i32
    %1 = arith.addi %0, %arg2 : i32
    %c0_i32 = arith.constant 0 : i32
    %c0_i32_0 = arith.constant 0 : i32
    return %arg0, %1, %c0_i32 : i32, i32, i32
  }
  func.func @transform_3(%arg0: i32, %arg1: i32, %arg2: i32) -> (i32, i32, i32, i32) {
    %c1_i32 = arith.constant 1 : i32
    %0 = arith.muli %arg1, %c1_i32 : i32
    %1 = arith.addi %0, %arg2 : i32
    %c0_i32 = arith.constant 0 : i32
    %c0_i32_0 = arith.constant 0 : i32
    %c0_i32_1 = arith.constant 0 : i32
    return %arg0, %c0_i32, %1, %c0_i32_0 : i32, i32, i32, i32
  }
  func.func @transform_4(%arg0: i32, %arg1: i32, %arg2: i32) -> (i32, i32, i32, i32) {
    %c1_i32 = arith.constant 1 : i32
    %0 = arith.muli %arg1, %c1_i32 : i32
    %1 = arith.addi %0, %arg2 : i32
    %c0_i32 = arith.constant 0 : i32
    %c0_i32_0 = arith.constant 0 : i32
    %c0_i32_1 = arith.constant 0 : i32
    return %arg0, %c0_i32, %1, %c0_i32_0 : i32, i32, i32, i32
  }
  func.func @transform_5(%arg0: i32, %arg1: i32, %arg2: i32) -> (i32, i32, i32, i32, i32) {
    %c0_i32 = arith.constant 0 : i32
    %c0_i32_0 = arith.constant 0 : i32
    %c0_i32_1 = arith.constant 0 : i32
    %c0_i32_2 = arith.constant 0 : i32
    return %arg0, %arg1, %c0_i32, %c0_i32_0, %c0_i32_1 : i32, i32, i32, i32, i32
  }
}

</mosaic_0001>

<bundles_post_ra>
// kernel: detection_loss.1
= control target key start
LH: loop header
LB: loop body
LE: loop exit
PB: predicated region body
PF: predicated region fallthrough
CT: control target
= control target key end

     0   :  { %10 = vsyncpa [#allocation3], 0  ;;  %s1567_s0 = inlined_call_operand.hbm [shape: f32[2,16,16], index: 0, kind: input, shape index: {}]   ;;  %s1568_s1 = inlined_call_operand.hbm [shape: f32[2,16,16], index: 1, kind: input, shape index: {}]   ;;  %s1569_s2 = inlined_call_operand.hbm [shape: f32[2,16,16], index: 2, kind: input, shape index: {}]   ;;  %s1570_s3 = inlined_call_operand.hbm [shape: f32[2,5,16,16], index: 3, kind: input, shape index: {}]   ;;  %s1571_s4 = inlined_call_operand.hbm [shape: f32[2,5,16,16], index: 4, kind: input, shape index: {}]   ;;  %s1572_s5 = inlined_call_operand.vmem [shape: f32[1,1,5,8,16], index: 5, kind: output, shape index: {}]  }
   0x1   :  { %11 = vsyncpa [#allocation5], 0 }
   0x2   :  { %12 = vsyncpa [#allocation8], 0  ;;  %s980_s18 = smov [#allocation4]   ;;  %s981_s20 = smov [#allocation7]  }
   0x3   :  { %s38_s19 = sshll.u32 %s980_s18, 4  ;;  %s70_s21 = sshll.u32 %s981_s20, 4  ;;  %s39_s19 = int_to_ptr.vmem [resolvable:$true] %s38_s19  ;;  %s1024_s21 = int_to_ptr.vmem [resolvable:$true] %s70_s21 }
   0x4   :  { %s864_s24 = scalar_lea.hbm %s1568_s1, 512 }
   0x5   :  { %p865_p0 = scmp.ne.s32.totalorder %s1568_s1, %s864_s24  ;;  %p868_p1 = scmp.lt.u32.totalorder %s864_s24, %s1568_s1 }
   0x7   :  { %p870_p2 = pnand %p868_p1, %p865_p0 }
   0x9   :  { %873 = shalt.err (!%p870_p2)
}
   0xa   :  { %s874_s29 = scalar_lea.vmem %s39_s19, 512  ;;  %p879_p4 = scmp.lt.s32.totalorder %s39_s19, %s39_s19 }
   0xb   :  { %p875_p3 = scmp.ne.s32.totalorder %s39_s19, %s874_s29  ;;  %p880_p5 = scmp.lt.s32.totalorder %s874_s29, %s874_s29 }
   0xd   :  { %p881_p6 = por %p880_p5, %p879_p4 }
   0xf   :  { %p882_p7 = pnand %p881_p6, %p875_p3 }
  0x11   :  { %885 = shalt.err (!%p882_p7)
}
  0x12   :  { %s982_s30 = smov 128   ;;  %s983_s6 = smov 8  }
  0x13   :  { %44 = dma.hbm_to_vmem [thread:$0]  %s1568_s1, 512, %s39_s19, [#allocation5], %s982_s30, %s982_s30, %s983_s6  }
  0x14   :  { %s886_s11 = scalar_lea.hbm %s1570_s3, 2560 }
  0x15   :  { %p887_p8 = scmp.ne.s32.totalorder %s1570_s3, %s886_s11  ;;  %p890_p9 = scmp.lt.u32.totalorder %s886_s11, %s1570_s3 }
  0x17   :  { %p892_p10 = pnand %p890_p9, %p887_p8 }
  0x19   :  { %895 = shalt.err (!%p892_p10)
}
  0x1a   :  { %s896_s16 = scalar_lea.vmem %s1024_s21, 2560  ;;  %p901_p12 = scmp.lt.s32.totalorder %s1024_s21, %s1024_s21 }
  0x1b   :  { %p897_p11 = scmp.ne.s32.totalorder %s1024_s21, %s896_s16  ;;  %p902_p13 = scmp.lt.s32.totalorder %s896_s16, %s896_s16 }
  0x1d   :  { %p903_p0 = por %p902_p13, %p901_p12 }
  0x1f   :  { %p904_p1 = pnand %p903_p0, %p897_p11 }
  0x21   :  { %907 = shalt.err (!%p904_p1)
}
  0x22   :  { %76 = dma.hbm_to_vmem [thread:$0]  %s1570_s3, 2560, %s1024_s21, [#allocation8], %s982_s30, %s982_s30, %s983_s6  }
  0x23   :  { %s984_s18 = smov [#allocation2]   ;;  %s985_s20 = smov [#allocation6]  }
  0x24   :  { %s22_s19 = sshll.u32 %s984_s18, 4  ;;  %s54_s22 = sshll.u32 %s985_s20, 4  ;;  %s23_s19 = int_to_ptr.vmem [resolvable:$true] %s22_s19  ;;  %s1061_s22 = int_to_ptr.vmem [resolvable:$true] %s54_s22 }
  0x25   :  { %s908_s25 = scalar_lea.hbm %s1567_s0, 512 }
  0x26   :  { %p909_p2 = scmp.ne.s32.totalorder %s1567_s0, %s908_s25  ;;  %p912_p3 = scmp.lt.u32.totalorder %s908_s25, %s1567_s0 }
  0x28   :  { %p914_p4 = pnand %p912_p3, %p909_p2 }
  0x2a   :  { %917 = shalt.err (!%p914_p4)
}
  0x2b   :  { %s918_s3 = scalar_lea.vmem %s23_s19, 512  ;;  %p923_p6 = scmp.lt.s32.totalorder %s23_s19, %s23_s19 }
  0x2c   :  { %p919_p5 = scmp.ne.s32.totalorder %s23_s19, %s918_s3  ;;  %p924_p7 = scmp.lt.s32.totalorder %s918_s3, %s918_s3 }
  0x2e   :  { %p925_p8 = por %p924_p7, %p923_p6 }
  0x30   :  { %p926_p9 = pnand %p925_p8, %p919_p5 }
  0x32   :  { %929 = shalt.err (!%p926_p9)
}
  0x33   :  { %28 = dma.hbm_to_vmem [thread:$0]  %s1567_s0, 512, %s23_s19, [#allocation3], %s982_s30, %s982_s30, %s983_s6  }
  0x34   :  { %s930_s10 = scalar_lea.hbm %s1569_s2, 512 }
  0x35   :  { %p931_p10 = scmp.ne.s32.totalorder %s1569_s2, %s930_s10  ;;  %p934_p11 = scmp.lt.u32.totalorder %s930_s10, %s1569_s2 }
  0x37   :  { %p936_p12 = pnand %p934_p11, %p931_p10 }
  0x39   :  { %939 = shalt.err (!%p936_p12)
}
  0x3a   :  { %s940_s15 = scalar_lea.vmem %s1061_s22, 512  ;;  %p945_p0 = scmp.lt.s32.totalorder %s1061_s22, %s1061_s22 }
  0x3b   :  { %p941_p13 = scmp.ne.s32.totalorder %s1061_s22, %s940_s15  ;;  %p946_p1 = scmp.lt.s32.totalorder %s940_s15, %s940_s15 }
  0x3d   :  { %p947_p2 = por %p946_p1, %p945_p0 }
  0x3f   :  { %p948_p3 = pnand %p947_p2, %p941_p13 }
  0x41   :  { %951 = shalt.err (!%p948_p3)
}
  0x42   :  { %60 = dma.hbm_to_vmem [thread:$0]  %s1569_s2, 512, %s1061_s22, [#allocation5], %s982_s30, %s982_s30, %s983_s6  }
  0x43   :  { %s986_s1 = smov [#allocation9]   ;;  %s952_s20 = scalar_lea.hbm %s1571_s4, 2560 }
  0x44   :  { %s86_s17 = sshll.u32 %s986_s1, 4  ;;  %p953_p4 = scmp.ne.s32.totalorder %s1571_s4, %s952_s20  ;;  %s87_s17 = int_to_ptr.vmem [resolvable:$true] %s86_s17 }
  0x45   :  { %p956_p5 = scmp.lt.u32.totalorder %s952_s20, %s1571_s4 }
  0x47   :  { %p958_p6 = pnand %p956_p5, %p953_p4 }
  0x49   :  { %961 = shalt.err (!%p958_p6)
}
  0x4a   :  { %s962_s27 = scalar_lea.vmem %s87_s17, 2560  ;;  %p967_p8 = scmp.lt.s32.totalorder %s87_s17, %s87_s17 }
  0x4b   :  { %p963_p7 = scmp.ne.s32.totalorder %s87_s17, %s962_s27  ;;  %p968_p9 = scmp.lt.s32.totalorder %s962_s27, %s962_s27 }
  0x4d   :  { %p969_p10 = por %p968_p9, %p967_p8 }
  0x4f   :  { %p970_p11 = pnand %p969_p10, %p963_p7 }
  0x51   :  { %973 = shalt.err (!%p970_p11)
}
  0x52   :  { %92 = dma.hbm_to_vmem [thread:$0]  %s1571_s4, 2560, %s87_s17, [#allocation8], %s982_s30, %s982_s30, %s983_s6  }
  0x53   :  { %974 = dma.done.wait [#allocation3], 512  }
  0x54   :  { %975 = vsyncadd [#allocation3], 4294966784 }
  0x55   :  { %976 = dma.done.wait [#allocation5], 1024  }
  0x56   :  { %977 = vsyncadd [#allocation5], 4294966272 }
  0x57   :  { %978 = dma.done.wait [#allocation8], 5120  }
  0x58   :  { %979 = vsyncadd [#allocation8], 4294962176  ;;  %vm122_vm0 = vcmask 130048   ;;  %v987_v0 = vmov 0.0   ;;  %v1133_v1 = vld [vmem:[#allocation2] sm:$0xff]  ;;  %v1135_v2 = vld [vmem:[#allocation2 + $0x8] sm:$0xff] }
  0x59   :  { %123 = vst.msk [vmem:[%s1572_s5] sm:$0xff] %vm122_vm0, %v987_v0  ;;  %124 = vst.msk [vmem:[%s1572_s5 + $0x8] sm:$0xff] %vm122_vm0, %v987_v0  ;;  %v1137_v3 = vld [vmem:[#allocation2 + $0x10] sm:$0xff]  ;;  %v702_v4 = vsel %vm122_vm0, %v1133_v1, 0.0  ;;  %v703_v5 = vsel %vm122_vm0, %v1135_v2, 0.0  ;;  %v1145_v7 = vld [vmem:[#allocation2 + $0x18] sm:$0xff] }
  0x5a   :  { %125 = vst.msk [vmem:[%s1572_s5 + $0x10] sm:$0xff] %vm122_vm0, %v987_v0  ;;  %126 = vst.msk [vmem:[%s1572_s5 + $0x18] sm:$0xff] %vm122_vm0, %v987_v0  ;;  %v705_v6 = vsel %vm122_vm0, %v1137_v3, 0.0  ;;  %v704_v8 = vadd.f32 %v703_v5, %v702_v4  ;;  %v707_v9 = vsel %vm122_vm0, %v1145_v7, 0.0  ;;  %v136_v10 = vld [vmem:[#allocation6] sm:$0xff]  ;;  %v137_v11 = vld [vmem:[#allocation6 + $0x8] sm:$0xff] }
  0x5b   :  { %127 = vst.msk [vmem:[%s1572_s5 + $0x20] sm:$0xff] %vm122_vm0, %v987_v0  ;;  %v138_v12 = vld [vmem:[#allocation6 + $0x10] sm:$0xff]  ;;  %v139_v15 = vld [vmem:[#allocation6 + $0x18] sm:$0xff]  ;;  %v140_v16 = vfloor.f32 %v136_v10  ;;  %v141_v17 = vfloor.f32 %v137_v11  ;;  %v132_v19 = vld [vmem:[#allocation4] sm:$0xff] }
  0x5c   :  { %v706_v14 = vadd.f32 %v705_v6, %v704_v8  ;;  %v142_v18 = vfloor.f32 %v138_v12  ;;  %v133_v20 = vld [vmem:[#allocation4 + $0x8] sm:$0xff]  ;;  %v134_v21 = vld [vmem:[#allocation4 + $0x10] sm:$0xff]  ;;  %v143_v22 = vfloor.f32 %v139_v15  ;;  %v135_v24 = vld [vmem:[#allocation4 + $0x18] sm:$0xff] }
  0x5d   :  { %v144_v25 = vsub.f32 1.0, %v140_v16  ;;  %v145_v26 = vsub.f32 1.0, %v141_v17  ;;  %v1152_v28 = vld [vmem:[#allocation7] sm:$0xff]  ;;  %v1154_v29 = vld [vmem:[#allocation7 + $0x10] sm:$0xff]  ;;  %v1156_v31 = vld [vmem:[#allocation7 + $0x8] sm:$0xff] }
  0x5e   :  { %v708_v23 = vadd.f32 %v707_v9, %v706_v14  ;;  %v146_v27 = vsub.f32 1.0, %v142_v18  ;;  %v147_v30 = vsub.f32 1.0, %v143_v22  ;;  %v1158_v32 = vld [vmem:[#allocation7 + $0x18] sm:$0xff]  ;;  %v1160_v33 = vld [vmem:[#allocation7 + $0x20] sm:$0xff]  ;;  %v192_v34 = vadd.f32 %v1154_v29, %v1152_v28  ;;  %v1164_v39 = vld [vmem:[#allocation7 + $0x30] sm:$0xff] }
  0x5f   :  { %v148_v36 = vmul.f32 %v144_v25, %v132_v19  ;;  %v149_v37 = vmul.f32 %v145_v26, %v133_v20  ;;  %v1166_v40 = vld [vmem:[#allocation7 + $0x50] sm:$0xff]  ;;  %v1168_v41 = vld [vmem:[#allocation7 + $0x60] sm:$0xff]  ;;  %v193_v43 = vadd.f32 %v1158_v32, %v1156_v31  ;;  %v196_v45 = vadd.f32 %v1164_v39, %v1160_v33  ;;  %v1184_v50 = vld [vmem:[#allocation7 + $0x28] sm:$0xff] }
  0x60   :  { %v700_v13 = vld [vmem:[%s1572_s5] sm:$0xff]  ;;  %v150_v38 = vmul.f32 %v146_v27, %v134_v21  ;;  %v151_v42 = vmul.f32 %v147_v30, %v135_v24  ;;  %v194_v44 = vadd.f32 %v1168_v41, %v1166_v40  ;;  %v1189_v55 = vld [vmem:[#allocation7 + $0x38] sm:$0xff]  ;;  %v1191_v56 = vld [vmem:[#allocation7 + $0x70] sm:$0xff] }
  0x61   :  { %v709_v35 = vadd.f32 %v708_v23, %v700_v13  ;;  %v713_v46 = vsel %vm122_vm0, %v148_v36, 0.0  ;;  %v714_v47 = vsel %vm122_vm0, %v149_v37, 0.0  ;;  %v724_v49 = vmul.f32 %v148_v36, %v1133_v1  ;;  %v1193_v57 = vld [vmem:[#allocation7 + $0x80] sm:$0xff]  ;;  %v790_v58 = vld [vmem:[%s1572_s5 + $0x8] sm:$0xff]  ;;  %v1200_v61 = vld [vmem:[#allocation7 + $0x58] sm:$0xff] }
  0x62   :  { %v716_v48 = vsel %vm122_vm0, %v150_v38, 0.0  ;;  %v715_v51 = vadd.f32 %v714_v47, %v713_v46  ;;  %v718_v52 = vsel %vm122_vm0, %v151_v42, 0.0  ;;  %v725_v53 = vmul.f32 %v149_v37, %v1135_v2  ;;  %v1208_v6 = vld [vmem:[#allocation7 + $0x68] sm:$0xff]  ;;  %v167_v8 = vld [vmem:[#allocation7 + $0x78] sm:$0xff]  ;;  %v1210_v11 = vld [vmem:[#allocation9] sm:$0xff] }
  0x63   :  { %710 = vst.msk [vmem:[%s1572_s5] sm:$0xff] %vm122_vm0, %v709_v35  ;;  %v726_v54 = vmul.f32 %v150_v38, %v1137_v3  ;;  %v727_v59 = vmul.f32 %v151_v42, %v1145_v7  ;;  %v728_v60 = vsel %vm122_vm0, %v724_v49, 0.0  ;;  %v197_v62 = vadd.f32 %v1189_v55, %v1184_v50  ;;  %v169_v9 = vld [vmem:[#allocation7 + $0x88] sm:$0xff]  ;;  %v1214_v13 = vld [vmem:[#allocation9 + $0x10] sm:$0xff]  ;;  %v1216_v14 = vld [vmem:[#allocation9 + $0x18] sm:$0xff] }
  0x64   :  { %v198_v63 = vadd.f32 %v1193_v57, %v1191_v56  ;;  %v717_v0 = vadd.f32 %v716_v48, %v715_v51  ;;  %v729_v4 = vsel %vm122_vm0, %v725_v53, 0.0  ;;  %v1212_v12 = vld [vmem:[#allocation9 + $0x8] sm:$0xff]  ;;  %v792_v16 = vld [vmem:[%s1572_s5 + $0x10] sm:$0xff]  ;;  %v176_v18 = vld [vmem:[#allocation9 + $0x20] sm:$0xff]  ;;  %v195_v21 = vadd.f32 %v1208_v6, %v1200_v61 }
  0x65   :  { %v731_v5 = vsel %vm122_vm0, %v726_v54, 0.0  ;;  %v730_v10 = vadd.f32 %v729_v4, %v728_v60  ;;  %v733_v17 = vsel %vm122_vm0, %v727_v59, 0.0  ;;  %v177_v19 = vld [vmem:[#allocation9 + $0x28] sm:$0xff]  ;;  %v178_v20 = vld [vmem:[#allocation9 + $0x30] sm:$0xff]  ;;  %v199_v22 = vadd.f32 %v169_v9, %v167_v8  ;;  %v184_v25 = vld [vmem:[#allocation9 + $0x60] sm:$0xff] }
  0x66   :  { %v719_v15 = vadd.f32 %v718_v52, %v717_v0  ;;  %v182_v24 = vld [vmem:[#allocation9 + $0x50] sm:$0xff]  ;;  %v1224_v27 = vmul.f32 %v196_v45, %v192_v34  ;;  %v1226_v30 = vmul.f32 %v197_v62, %v193_v43  ;;  %v1228_v35 = vmul.f32 %v198_v63, %v194_v44  ;;  %v183_v37 = vld [vmem:[#allocation9 + $0x58] sm:$0xff]  ;;  %v185_v38 = vld [vmem:[#allocation9 + $0x68] sm:$0xff] }
  0x67   :  { %v732_v23 = vadd.f32 %v731_v5, %v730_v10  ;;  %v186_v26 = vld [vmem:[#allocation9 + $0x70] sm:$0xff]  ;;  %v187_v42 = vld [vmem:[#allocation9 + $0x78] sm:$0xff]  ;;  %v204_v46 = vadd.f32 %v1214_v13, %v1210_v11  ;;  %v205_v47 = vadd.f32 %v1216_v14, %v1212_v12  ;;  %v206_v48 = vadd.f32 %v184_v25, %v182_v24  ;;  %v188_v52 = vld [vmem:[#allocation9 + $0x80] sm:$0xff] }
  0x68   :  { %v720_v36 = vadd.f32 %v790_v58, %v719_v15  ;;  %v179_v51 = vld [vmem:[#allocation9 + $0x38] sm:$0xff]  ;;  %v189_v34 = vld [vmem:[#allocation9 + $0x88] sm:$0xff]  ;;  %v207_v45 = vadd.f32 %v185_v38, %v183_v37  ;;  %v208_v43 = vadd.f32 %v178_v20, %v176_v18  ;;  %v216_v44 = vmin.f32 %v1160_v33, %v176_v18  ;;  %v160_v15 = vld [vmem:[#allocation7 + $0x40] sm:$0xff] }
  0x69   :  { %v734_v49 = vadd.f32 %v733_v17, %v732_v23  ;;  %v209_v53 = vadd.f32 %v179_v51, %v177_v19  ;;  %v210_v54 = vadd.f32 %v188_v52, %v186_v26  ;;  %v217_v58 = vmin.f32 %v1184_v50, %v177_v19  ;;  %v180_v17 = vld [vmem:[#allocation9 + $0x40] sm:$0xff]  ;;  %v181_v23 = vld [vmem:[#allocation9 + $0x48] sm:$0xff] }
  0x6a   :  { %791 = vst.msk [vmem:[%s1572_s5 + $0x8] sm:$0xff] %vm122_vm0, %v720_v36  ;;  %v218_v59 = vmin.f32 %v1191_v56, %v186_v26  ;;  %v211_v62 = vadd.f32 %v189_v34, %v187_v42  ;;  %v219_v63 = vmin.f32 %v167_v8, %v187_v42  ;;  %v220_v0 = vmin.f32 %v1164_v39, %v178_v20 }
  0x6b   :  { %v735_v60 = vadd.f32 %v792_v16, %v734_v49  ;;  %v221_v4 = vmin.f32 %v1189_v55, %v179_v51  ;;  %v222_v33 = vmin.f32 %v1193_v57, %v188_v52  ;;  %v223_v5 = vmin.f32 %v169_v9, %v189_v34 }
  0x6c   :  { %v228_v10 = vmin.f32 %v1152_v28, %v1210_v11  ;;  %v224_v50 = vadd.f32 %v220_v0, %v216_v44  ;;  %v229_v56 = vmin.f32 %v1156_v31, %v1212_v12  ;;  %v230_v39 = vmin.f32 %v1166_v40, %v182_v24  ;;  %v170_v0 = vld [vmem:[#allocation7 + $0x90] sm:$0xff] }
  0x6d   :  { %793 = vst.msk [vmem:[%s1572_s5 + $0x10] sm:$0xff] %vm122_vm0, %v735_v60  ;;  %v231_v55 = vmin.f32 %v1200_v61, %v183_v37  ;;  %v225_v57 = vadd.f32 %v221_v4, %v217_v58  ;;  %v226_v8 = vadd.f32 %v222_v33, %v218_v59  ;;  %v227_v9 = vadd.f32 %v223_v5, %v219_v63  ;;  %v161_v61 = vld [vmem:[#allocation7 + $0x48] sm:$0xff]  ;;  %v190_v4 = vld [vmem:[#allocation9 + $0x90] sm:$0xff] }
  0x6e   :  { %v232_v28 = vmin.f32 %v1154_v29, %v1214_v13  ;;  %v233_v11 = vmin.f32 %v1158_v32, %v1216_v14  ;;  %v234_v16 = vmin.f32 %v1168_v41, %v184_v25  ;;  %v235_v18 = vmin.f32 %v1208_v6, %v185_v38 }
  0x6f   :  { %v1260_v19 = vsub.f32 %v180_v17, %v160_v15  ;;  %v203_v31 = vmul.f32 %v199_v22, %v195_v21  ;;  %v212_v12 = vmul.f32 %v208_v43, %v204_v46  ;;  %v213_v40 = vmul.f32 %v209_v53, %v205_v47 }
  0x70   :  { %v236_v20 = vadd.f32 %v232_v28, %v228_v10  ;;  %v237_v24 = vadd.f32 %v233_v11, %v229_v56  ;;  %v238_v26 = vadd.f32 %v234_v16, %v230_v39  ;;  %v239_v36 = vadd.f32 %v235_v18, %v231_v55 }
  0x71   :  { %v256_v29 = vand.u32 2147483647, %v1260_v19  ;;  %v214_v13 = vmul.f32 %v210_v54, %v206_v48  ;;  %v215_v37 = vmul.f32 %v211_v62, %v207_v45  ;;  %v259_v41 = vand.u32 2139095040, %v1260_v19 }
  0x72   :  { %v240_v32 = vmul.f32 %v236_v20, %v224_v50  ;;  %v241_v14 = vmul.f32 %v237_v24, %v225_v57  ;;  %v242_v6 = vmul.f32 %v238_v26, %v226_v8  ;;  %v243_v25 = vmul.f32 %v239_v36, %v227_v9 }
  0x73   :  { %v1264_v38 = vsub.f32 %v181_v23, %v161_v61  ;;  %v260_v42 = vshrl.u32 %v259_v41, 23  ;;  %v263_v46 = vand.u32 8388607, %v256_v29  ;;  %v1279_v50 = vsub.f32 %v190_v4, %v170_v0 }
  0x74   :  { %v244_v21 = vsub.f32 %v1224_v27, %v240_v32  ;;  %v684_v22 = vadd.f32 1.0, %v240_v32  ;;  %v245_v47 = vsub.f32 %v1226_v30, %v241_v14  ;;  %v246_v48 = vsub.f32 %v1228_v35, %v242_v6 }
  0x75   :  { %v247_v49 = vsub.f32 %v203_v31, %v243_v25  ;;  %v685_v51 = vadd.f32 1.0, %v241_v14  ;;  %v686_v34 = vadd.f32 1.0, %v242_v6  ;;  %v687_v45 = vadd.f32 1.0, %v243_v25 }
  0x76   :  { %v248_v52 = vadd.f32 %v244_v21, %v212_v12  ;;  %828 = vlog2.f32 %v684_v22  ;;  %v249_v43 = vadd.f32 %v245_v47, %v213_v40  ;;  %v250_v44 = vadd.f32 %v246_v48, %v214_v13 }
  0x77   :  { %v251_v53 = vadd.f32 %v247_v49, %v215_v37  ;;  %830 = vlog2.f32 %v685_v51  ;;  %v774_v54 = vadd.s32 4294967169, %v260_v42  ;;  %v359_v35 = vand.u32 2147483647, %v1264_v38 }
  0x78   :  { %v672_v27 = vadd.f32 1.0, %v248_v52  ;;  %832 = vlog2.f32 %v686_v34  ;;  %v673_v58 = vadd.f32 1.0, %v249_v43  ;;  %v674_v59 = vadd.f32 1.0, %v250_v44 }
  0x79   :  { %v675_v60 = vadd.f32 1.0, %v251_v53  ;;  %834 = vlog2.f32 %v687_v45  ;;  %v266_v30 = vadd.s32 1, %v774_v54  ;;  %v264_v62 = vor.u32 8388608, %v263_v46 }
  0x7a   :  { %836 = vlog2.f32 %v672_v27  ;;  %v362_v63 = vand.u32 2139095040, %v1264_v38  ;;  %v1275_v33 = vand.u32 8388607, %v359_v35  ;;  %v988_v57 = vmov 683565275  }
  0x7b   :  { %838 = vlog2.f32 %v673_v58  ;;  %vm267_vm1 = vcmp.gt.s32.totalorder %v266_v30, 0  ;;  %v1281_v56 = vshll.u32 %v264_v62, 8  ;;  %v989_v9 = vmov 2475754826  }
  0x7c   :  { %840 = vlog2.f32 %v674_v59  ;;  %v268_v5 = vsel %vm267_vm1, %v266_v30, 0  ;;  %v363_v10 = vshrl.u32 %v362_v63, 23  ;;  %v367_v11 = vor.u32 8388608, %v1275_v33 }
  0x7d   :  { %842 = vlog2.f32 %v675_v60  ;;  %v1277_v15 = vshrl.u32 %v268_v5, 5  ;;  %v270_v17 = vand.u32 31, %v268_v5  ;;  %v990_v31 = vmov 2131351028  }
  0x7e   :  { %v991_v40 = vmov 2102212464   ;;  %v778_v61 = vadd.s32 4294967169, %v363_v10  ;;  %v992_v36 = vmov 920167782  }
  0x7f   :  { %v271_v55 = vsub.s32 32, %v270_v17  ;;  %v273_v8 = vshll.u32 %v988_v57, %v270_v17  ;;  %v276_v28 = vshll.u32 %v989_v9, %v270_v17  ;;  %v279_v12 = vshll.u32 %v990_v31, %v270_v17 }
  0x80   :  { %v829_v39 = vpop.eup %828  ;;  %v282_v20 = vshll.u32 %v991_v40, %v270_v17  ;;  %v285_v13 = vshll.u32 %v992_v36, %v270_v17  ;;  %vm288_vm2 = vcmp.lt.s32.totalorder %v1277_v15, 1  ;;  %v993_v6 = vmov 1326507024  }
  0x81   :  { %v831_v16 = vpop.eup %830  ;;  %v689_v18 = vmul.f32 0.6931472, %v829_v39  ;;  %v274_v24 = vshrl.u32 %v989_v9, %v271_v55  ;;  %v277_v26 = vshrl.u32 %v990_v31, %v271_v55  ;;  %v280_v41 = vshrl.u32 %v991_v40, %v271_v55 }
  0x82   :  { %v833_v23 = vpop.eup %832  ;;  %v691_v32 = vmul.f32 0.6931472, %v831_v16  ;;  %v283_v14 = vshrl.u32 %v992_v36, %v271_v55  ;;  %v286_v25 = vshrl.u32 %v993_v6, %v271_v55  ;;  %v272_v42 = vshrl.u32 %v988_v57, %v271_v55 }
  0x83   :  { %v835_v37 = vpop.eup %834  ;;  %v693_v22 = vmul.f32 0.6931472, %v833_v23  ;;  %v275_v46 = vor.u32 %v274_v24, %v273_v8  ;;  %v278_v47 = vor.u32 %v277_v26, %v276_v28  ;;  %v281_v52 = vor.u32 %v280_v41, %v279_v12 }
  0x84   :  { %v837_v21 = vpop.eup %836  ;;  %v695_v51 = vmul.f32 0.6931472, %v835_v37  ;;  %v284_v34 = vor.u32 %v283_v14, %v282_v20  ;;  %vm289_vm3 = vcmp.lt.s32.totalorder %v1277_v15, 2  ;;  %vm290_vm4 = vcmp.lt.s32.totalorder %v1277_v15, 3 }
  0x85   :  { %v839_v48 = vpop.eup %838  ;;  %v677_v49 = vmul.f32 0.6931472, %v837_v21  ;;  %vm291_vm5 = vcmp.lt.s32.totalorder %v1277_v15, 4  ;;  %v287_v54 = vor.u32 %v286_v25, %v285_v13  ;;  %v296_v30 = vsel %vm288_vm2, %v275_v46, %v278_v47  ;;  %v794_v25 = vld [vmem:[%s1572_s5 + $0x18] sm:$0xff] }
  0x86   :  { %v841_v45 = vpop.eup %840  ;;  %v679_v43 = vmul.f32 0.6931472, %v839_v48  ;;  %v293_v58 = vsel %vm291_vm5, %v281_v52, 2102212464  ;;  %v297_v62 = vsel %vm291_vm5, %v284_v34, 920167782  ;;  %v292_v4 = vsel %vm288_vm2, %v272_v42, %v275_v46 }
  0x87   :  { %v843_v44 = vpop.eup %842  ;;  %v681_v53 = vmul.f32 0.6931472, %v841_v45  ;;  %v696_v27 = vsub.f32 %v677_v49, %v689_v18  ;;  %v298_v5 = vsel %vm290_vm4, %v281_v52, %v297_v62  ;;  %v294_v39 = vsel %vm290_vm4, %v278_v47, %v293_v58 }
  0x88   :  { %v683_v59 = vmul.f32 0.6931472, %v843_v44  ;;  %v697_v60 = vsub.f32 %v679_v43, %v691_v32  ;;  %v300_v55 = vsel %vm288_vm2, %v278_v47, %v281_v52  ;;  %v301_v16 = vsel %vm291_vm5, %v287_v54, 1326507024 }
  0x89   :  { %v698_v63 = vsub.f32 %v681_v53, %v693_v22  ;;  %v739_v0 = vmul.f32 %v696_v27, %v1133_v1  ;;  %v299_v1 = vsel %vm289_vm3, %v296_v30, %v298_v5  ;;  %v302_v12 = vsel %vm290_vm4, %v284_v34, %v301_v16 }
  0x8a   :  { %v699_v10 = vsub.f32 %v683_v59, %v695_v51  ;;  %v740_v17 = vmul.f32 %v697_v60, %v1135_v2  ;;  %v369_v20 = vadd.s32 1, %v778_v61  ;;  %v303_v26 = vsel %vm289_vm3, %v300_v55, %v302_v12 }
  0x8b   :  { %v741_v8 = vmul.f32 %v698_v63, %v1137_v3  ;;  %v743_v28 = vsel %vm122_vm0, %v739_v0, 0.0  ;;  %v295_v3 = vsel %vm289_vm3, %v292_v4, %v294_v39  ;;  %v1346_v42 = vshll.u32 %v367_v11, 8 }
  0x8c   :  { %v742_v18 = vmul.f32 %v699_v10, %v1145_v7  ;;  %v744_v2 = vsel %vm122_vm0, %v740_v17, 0.0  ;;  %v1332_v37 = vmul.u32.u64.low %v1281_v56, %v303_v26  ;;  %v1333_v7 = vmul.u32.u64.high %v1281_v56, %v303_v26, %v1332_v37 }
  0x8d   :  { %v745_v23 = vadd.f32 %v744_v2, %v743_v28  ;;  %v746_v24 = vsel %vm122_vm0, %v741_v8, 0.0  ;;  %vm370_vm6 = vcmp.gt.s32.totalorder %v369_v20, 0  ;;  %v311_v22 = vmul.u32 %v1281_v56, %v295_v3 }
  0x8e   :  { %v748_v13 = vsel %vm122_vm0, %v742_v18, 0.0  ;;  %v1336_v41 = vmul.u32.u64.low %v1281_v56, %v299_v1  ;;  %v1337_v61 = vmul.u32.u64.high %v1281_v56, %v299_v1, %v1336_v41  ;;  %v371_v14 = vsel %vm370_vm6, %v369_v20, 0 }
  0x8f   :  { %v747_v32 = vadd.f32 %v746_v24, %v745_v23  ;;  %v373_v15 = vand.u32 31, %v371_v14  ;;  %v465_v46 = vand.u32 2139095040, %v1279_v50  ;;  %v372_v47 = vshrl.u32 %v371_v14, 5 }
  0x90   :  { %vm313_vm7 = vc.u32 %v1333_v7, %v1336_v41  ;;  %v314_v52 = vadd.s32 1, %v1337_v61 }
  0x91   :  { %v749_v21 = vadd.f32 %v748_v13, %v747_v32  ;;  %v374_v48 = vsub.s32 32, %v373_v15  ;;  %v376_v49 = vshll.u32 %v988_v57, %v373_v15  ;;  %v379_v34 = vshll.u32 %v989_v9, %v373_v15 }
  0x92   :  { %v382_v56 = vshll.u32 %v990_v31, %v373_v15  ;;  %v315_v44 = vsel %vm313_vm7, %v314_v52, %v1337_v61  ;;  %v385_v53 = vshll.u32 %v991_v40, %v373_v15  ;;  %v388_v54 = vshll.u32 %v992_v36, %v373_v15 }
  0x93   :  { %v750_v51 = vadd.f32 %v794_v25, %v749_v21  ;;  %v375_v33 = vshrl.u32 %v988_v57, %v374_v48  ;;  %v377_v11 = vshrl.u32 %v989_v9, %v374_v48  ;;  %v380_v45 = vshrl.u32 %v990_v31, %v374_v48 }
  0x94   :  { %v383_v43 = vshrl.u32 %v991_v40, %v374_v48  ;;  %v386_v27 = vshrl.u32 %v992_v36, %v374_v48  ;;  %v316_v58 = vadd.s32 %v315_v44, %v311_v22  ;;  %v389_v63 = vshrl.u32 %v993_v6, %v374_v48  ;;  %v191_v44 = vld [vmem:[#allocation9 + $0x98] sm:$0xff] }
  0x95   :  { %795 = vst.msk [vmem:[%s1572_s5 + $0x18] sm:$0xff] %vm122_vm0, %v750_v51  ;;  %v378_v59 = vor.u32 %v377_v11, %v376_v49  ;;  %v381_v60 = vor.u32 %v380_v45, %v379_v34  ;;  %vm391_vm8 = vcmp.lt.s32.totalorder %v372_v47, 1  ;;  %v466_v0 = vshrl.u32 %v465_v46, 23 }
  0x96   :  { %v384_v30 = vor.u32 %v383_v43, %v382_v56  ;;  %v387_v62 = vor.u32 %v386_v27, %v385_v53  ;;  %v317_v4 = vadd.s32 536870912, %v316_v58  ;;  %vm392_vm9 = vcmp.lt.s32.totalorder %v372_v47, 2  ;;  %v171_v43 = vld [vmem:[#allocation7 + $0x98] sm:$0xff] }
  0x97   :  { %vm393_vm10 = vcmp.lt.s32.totalorder %v372_v47, 3  ;;  %vm394_vm11 = vcmp.lt.s32.totalorder %v372_v47, 4  ;;  %v390_v5 = vor.u32 %v389_v63, %v388_v54  ;;  %v399_v17 = vsel %vm391_vm8, %v378_v59, %v381_v60 }
  0x98   :  { %v396_v10 = vsel %vm394_vm11, %v384_v30, 2102212464  ;;  %v400_v39 = vsel %vm394_vm11, %v387_v62, 920167782  ;;  %v1368_v55 = vshrl.u32 %v317_v4, 30  ;;  %v395_v8 = vsel %vm391_vm8, %v375_v33, %v378_v59 }
  0x99   :  { %v401_v28 = vsel %vm393_vm10, %v384_v30, %v400_v39  ;;  %v403_v1 = vsel %vm391_vm8, %v381_v60, %v384_v30  ;;  %v397_v16 = vsel %vm393_vm10, %v381_v60, %v396_v10  ;;  %v404_v2 = vsel %vm394_vm11, %v390_v5, 1326507024 }
  0x9a   :  { %v402_v18 = vsel %vm392_vm9, %v399_v17, %v401_v28  ;;  %v782_v12 = vadd.s32 4294967169, %v466_v0  ;;  %v319_v20 = vshll.u32 %v1368_v55, 30  ;;  %v405_v23 = vsel %vm393_vm10, %v387_v62, %v404_v2 }
  0x9b   :  { %v406_v24 = vsel %vm392_vm9, %v403_v1, %v405_v23  ;;  %v1374_v3 = vmul.u32.u64.low %v1346_v42, %v402_v18  ;;  %v1375_v26 = vmul.u32.u64.high %v1346_v42, %v402_v18, %v1374_v3  ;;  %v398_v32 = vsel %vm392_vm9, %v395_v8, %v397_v16 }
  0x9c   :  { %v472_v13 = vadd.s32 1, %v782_v12  ;;  %v1378_v37 = vsub.s32 %v316_v58, %v319_v20  ;;  %v1382_v61 = vmul.u32.u64.low %v1346_v42, %v406_v24  ;;  %v1383_v14 = vmul.u32.u64.high %v1346_v42, %v406_v24, %v1382_v61 }
  0x9d   :  { %v414_v21 = vmul.u32 %v1346_v42, %v398_v32  ;;  %v417_v22 = vadd.s32 1, %v1375_v26  ;;  %v462_v46 = vand.u32 2147483647, %v1279_v50  ;;  %v1407_v0 = vsub.f32 %v191_v44, %v171_v43 }
  0x9e   :  { %vm473_vm12 = vcmp.gt.s32.totalorder %v472_v13, 0  ;;  %v322_v25 = vsub.s32 0, %v1378_v37  ;;  %vm416_vm13 = vc.u32 %v1383_v14, %v1374_v3 }
  0x9f   :  { %v474_v15 = vsel %vm473_vm12, %v472_v13, 0  ;;  %v418_v51 = vsel %vm416_vm13, %v417_v22, %v1375_v26  ;;  %v469_v34 = vand.u32 8388607, %v462_v46  ;;  %v568_v61 = vand.u32 2139095040, %v1407_v0 }
  0xa0   :  { %v476_v48 = vand.u32 31, %v474_v15  ;;  %v775_v49 = vmin.u32 %v322_v25, %v1378_v37  ;;  %v419_v52 = vadd.s32 %v418_v51, %v414_v21  ;;  %v475_v56 = vshrl.u32 %v474_v15, 5 }
  0xa1   :  { %v470_v5 = vor.u32 8388608, %v469_v34  ;;  %vm258_vm13 = vcmp.lt.s32.totalorder %v1260_v19, 0 }
  0xa2   :  { %v477_v47 = vsub.s32 32, %v476_v48  ;;  %v324_v33 = vclz %v775_v49  ;;  %v479_v42 = vshll.u32 %v988_v57, %v476_v48  ;;  %v482_v45 = vshll.u32 %v989_v9, %v476_v48 }
  0xa3   :  { %v420_v53 = vadd.s32 536870912, %v419_v52  ;;  %v488_v54 = vshll.u32 %v991_v40, %v476_v48  ;;  %v485_v59 = vshll.u32 %v990_v31, %v476_v48  ;;  %v491_v30 = vshll.u32 %v992_v36, %v476_v48 }
  0xa4   :  { %v480_v11 = vshrl.u32 %v989_v9, %v477_v47  ;;  %v483_v27 = vshrl.u32 %v990_v31, %v477_v47  ;;  %v489_v58 = vshrl.u32 %v992_v36, %v477_v47  ;;  %v486_v60 = vshrl.u32 %v991_v40, %v477_v47 }
  0xa5   :  { %v492_v62 = vshrl.u32 %v993_v6, %v477_v47  ;;  %v1405_v63 = vshrl.u32 %v420_v53, 30  ;;  %v776_v4 = vadd.s32 4294967294, %v324_v33  ;;  %vm494_vm14 = vcmp.lt.s32.totalorder %v475_v56, 1 }
  0xa6   :  { %v481_v17 = vor.u32 %v480_v11, %v479_v42  ;;  %v484_v39 = vor.u32 %v483_v27, %v482_v45  ;;  %v490_v8 = vor.u32 %v489_v58, %v488_v54  ;;  %v487_v28 = vor.u32 %v486_v60, %v485_v59 }
  0xa7   :  { %v422_v10 = vshll.u32 %v1405_v63, 30  ;;  %v493_v1 = vor.u32 %v492_v62, %v491_v30  ;;  %vm497_vm15 = vcmp.lt.s32.totalorder %v475_v56, 4  ;;  %v478_v18 = vshrl.u32 %v988_v57, %v477_v47 }
  0xa8   :  { %vm496_vm1 = vcmp.lt.s32.totalorder %v475_v56, 3  ;;  %vm777_vm2 = vcmp.lt.s32.totalorder %v776_v4, 0  ;;  %v499_v2 = vsel %vm497_vm15, %v487_v28, 2102212464  ;;  %v510_v12 = vshll.u32 %v470_v5, 8 }
  0xa9   :  { %v1410_v16 = vsub.s32 %v419_v52, %v422_v10  ;;  %vm495_vm3 = vcmp.lt.s32.totalorder %v475_v56, 2  ;;  %v502_v23 = vsel %vm494_vm14, %v481_v17, %v484_v39  ;;  %v503_v24 = vsel %vm497_vm15, %v490_v8, 920167782 }
  0xaa   :  { %v504_v26 = vsel %vm496_vm1, %v487_v28, %v503_v24  ;;  %v506_v13 = vsel %vm494_vm14, %v484_v39, %v487_v28  ;;  %v507_v32 = vsel %vm497_vm15, %v493_v1, 1326507024  ;;  %v498_v15 = vsel %vm494_vm14, %v478_v18, %v481_v17 }
  0xab   :  { %v425_v20 = vsub.s32 0, %v1410_v16  ;;  %v500_v21 = vsel %vm496_vm1, %v484_v39, %v499_v2  ;;  %v327_v22 = vsel %vm777_vm2, 0, %v776_v4  ;;  %v505_v48 = vsel %vm495_vm3, %v502_v23, %v504_v26 }
  0xac   :  { %v508_v49 = vsel %vm496_vm1, %v490_v8, %v507_v32  ;;  %v1424_v52 = vmul.u32.u64.low %v510_v12, %v505_v48  ;;  %v1425_v34 = vmul.u32.u64.high %v510_v12, %v505_v48, %v1424_v52  ;;  %v501_v33 = vsel %vm495_vm3, %v498_v15, %v500_v21 }
  0xad   :  { %v779_v25 = vmin.u32 %v425_v20, %v1410_v16  ;;  %v509_v51 = vsel %vm495_vm3, %v506_v13, %v508_v49  ;;  %v569_v45 = vshrl.u32 %v568_v61, 23  ;;  %v332_v44 = vsub.s32 4294967266, %v327_v22 }
  0xae   :  { %v1429_v42 = vmul.u32.u64.low %v510_v12, %v509_v51  ;;  %v1430_v11 = vmul.u32.u64.high %v510_v12, %v509_v51, %v1429_v42  ;;  %v517_v27 = vmul.u32 %v510_v12, %v501_v33  ;;  %v520_v54 = vadd.s32 1, %v1425_v34 }
  0xaf   :  { %v427_v47 = vclz %v779_v25  ;;  %v786_v53 = vadd.s32 4294967169, %v569_v45  ;;  %v312_v58 = vadd.s32 %v1336_v41, %v1333_v7  ;;  %v328_v59 = vsub.s32 32, %v327_v22 }
  0xb0   :  { %vm519_vm5 = vc.u32 %v1430_v11, %v1424_v52  ;;  %v333_v56 = vadd.s32 127, %v332_v44  ;;  %v329_v5 = vshll.u32 %v1378_v37, %v327_v22  ;;  %v565_v17 = vand.u32 2147483647, %v1407_v0 }
  0xb1   :  { %v780_v43 = vadd.s32 4294967294, %v427_v47  ;;  %v521_v60 = vsel %vm519_vm5, %v520_v54, %v1425_v34  ;;  %v575_v30 = vadd.s32 1, %v786_v53  ;;  %v330_v8 = vshrl.u32 %v312_v58, %v328_v59 }
  0xb2   :  { %v522_v4 = vadd.s32 %v521_v60, %v517_v27  ;;  %v334_v28 = vshll.u32 %v333_v56, 23  ;;  %v415_v41 = vadd.s32 %v1374_v3, %v1383_v14  ;;  %v572_v37 = vand.u32 8388607, %v565_v17 }
  0xb3   :  { %vm781_vm4 = vcmp.lt.s32.totalorder %v780_v43, 0  ;;  %vm576_vm6 = vcmp.gt.s32.totalorder %v575_v30, 0  ;;  %v1447_v23 = vor.u32 %v330_v8, %v329_v5  ;;  %v518_v54 = vadd.s32 %v1424_v52, %v1430_v11 }
  0xb4   :  { %v430_v62 = vsel %vm781_vm4, 0, %v780_v43  ;;  %v523_v10 = vadd.s32 536870912, %v522_v4  ;;  %v577_v39 = vsel %vm576_vm6, %v575_v30, 0  ;;  %v1449_v24 = vor.u32 4788187, %v334_v28 }
  0xb5   :  { %v435_v1 = vsub.s32 4294967266, %v430_v62  ;;  %v579_v18 = vand.u32 31, %v577_v39  ;;  %v431_v12 = vsub.s32 32, %v430_v62  ;;  %v432_v48 = vshll.u32 %v1410_v16, %v430_v62 }
  0xb6   :  { %v1440_v2 = vshrl.u32 %v523_v10, 30  ;;  %v573_v51 = vor.u32 8388608, %v572_v37  ;;  %v578_v33 = vshrl.u32 %v577_v39, 5  ;;  %v336_v43 = vand.u32 2147483647, %v1449_v24 }
  0xb7   :  { %v580_v7 = vsub.s32 32, %v579_v18  ;;  %v436_v26 = vadd.s32 127, %v435_v1  ;;  %v582_v13 = vshll.u32 %v988_v57, %v579_v18  ;;  %v585_v61 = vshll.u32 %v989_v9, %v579_v18 }
  0xb8   :  { %v525_v20 = vshll.u32 %v1440_v2, 30  ;;  %v588_v25 = vshll.u32 %v990_v31, %v579_v18  ;;  %v591_v3 = vshll.u32 %v991_v40, %v579_v18  ;;  %v433_v49 = vshrl.u32 %v415_v41, %v431_v12 }
  0xb9   :  { %v583_v14 = vshrl.u32 %v989_v9, %v580_v7  ;;  %v586_v15 = vshrl.u32 %v990_v31, %v580_v7  ;;  %v589_v21 = vshrl.u32 %v991_v40, %v580_v7  ;;  %v592_v22 = vshrl.u32 %v992_v36, %v580_v7 }
  0xba   :  { %v526_v32 = vsub.s32 %v522_v4, %v525_v20  ;;  %v437_v34 = vshll.u32 %v436_v26, 23  ;;  %v594_v42 = vshll.u32 %v992_v36, %v579_v18  ;;  %v595_v45 = vshrl.u32 %v993_v6, %v580_v7 }
  0xbb   :  { %v338_v9 = vcvt.s32.f32 %v1447_v23  ;;  %v581_v40 = vshrl.u32 %v988_v57, %v580_v7  ;;  %v584_v44 = vor.u32 %v583_v14, %v582_v13  ;;  %v587_v53 = vor.u32 %v586_v15, %v585_v61 }
  0xbc   :  { %v528_v47 = vsub.s32 0, %v526_v32  ;;  %v590_v27 = vor.u32 %v589_v21, %v588_v25  ;;  %v593_v16 = vor.u32 %v592_v22, %v591_v3  ;;  %v596_v59 = vor.u32 %v595_v45, %v594_v42 }
  0xbd   :  { %v613_v56 = vshll.u32 %v573_v51, 8  ;;  %v434_v36 = vor.u32 %v433_v49, %v432_v48  ;;  %v438_v60 = vor.u32 4788187, %v437_v34  ;;  %vm597_vm7 = vcmp.lt.s32.totalorder %v578_v33, 1 }
  0xbe   :  { %v783_v31 = vmin.u32 %v528_v47, %v526_v32  ;;  %vm598_vm8 = vcmp.lt.s32.totalorder %v578_v33, 2  ;;  %vm599_vm9 = vcmp.lt.s32.totalorder %v578_v33, 3  ;;  %vm600_vm10 = vcmp.lt.s32.totalorder %v578_v33, 4 }
  0xbf   :  { %v601_v30 = vsel %vm597_vm7, %v581_v40, %v584_v44  ;;  %v602_v62 = vsel %vm600_vm10, %v590_v27, 2102212464  ;;  %v605_v57 = vsel %vm597_vm7, %v584_v44, %v587_v53  ;;  %v606_v4 = vsel %vm600_vm10, %v593_v16, 920167782 }
  0xc0   :  { %v530_v58 = vclz %v783_v31  ;;  %v609_v5 = vsel %vm597_vm7, %v587_v53, %v590_v27  ;;  %v603_v10 = vsel %vm599_vm9, %v587_v53, %v602_v62  ;;  %v607_v39 = vsel %vm599_vm9, %v590_v27, %v606_v4 }
  0xc1   :  { %v610_v8 = vsel %vm600_vm10, %v596_v59, 1326507024  ;;  %v604_v11 = vsel %vm598_vm8, %v601_v30, %v603_v10  ;;  %v608_v28 = vsel %vm598_vm8, %v605_v57, %v607_v39  ;;  %v439_v26 = vand.u32 2147483647, %v438_v60 }
  0xc2   :  { %v784_v6 = vadd.s32 4294967294, %v530_v58  ;;  %v611_v1 = vsel %vm599_vm9, %v593_v16, %v610_v8  ;;  %v1473_v23 = vmul.u32.u64.low %v613_v56, %v608_v28  ;;  %v1474_v24 = vmul.u32.u64.high %v613_v56, %v608_v28, %v1473_v23 }
  0xc3   :  { %v612_v12 = vsel %vm598_vm8, %v609_v5, %v611_v1  ;;  %v441_v13 = vcvt.s32.f32 %v434_v36  ;;  %v339_v3 = vmul.f32 %v338_v9, %v336_v43  ;;  %v620_v21 = vmul.u32 %v613_v56, %v604_v11 }
  0xc4   :  { %vm785_vm11 = vcmp.lt.s32.totalorder %v784_v6, 0  ;;  %v1470_v20 = vmul.u32.u64.low %v613_v56, %v612_v12  ;;  %v1471_v37 = vmul.u32.u64.high %v613_v56, %v612_v12, %v1470_v20  ;;  %vm361_vm14 = vcmp.lt.s32.totalorder %v1264_v38, 0 }
  0xc5   :  { %v533_v52 = vsel %vm785_vm11, 0, %v784_v6  ;;  %v442_v22 = vmul.f32 %v441_v13, %v439_v26  ;;  %v340_v51 = vxor.u32 2147483648, %v339_v3  ;;  %vm1483_vm15 = vcmp.le.f32.partialorder %v256_v29, 0.7853982 }
  0xc6   :  { %v534_v18 = vsub.s32 32, %v533_v52  ;;  %v535_v7 = vshll.u32 %v526_v32, %v533_v52  ;;  %v538_v41 = vsub.s32 4294967266, %v533_v52  ;;  %vm622_vm12 = vc.u32 %v1471_v37, %v1473_v23 }
  0xc7   :  { %v623_v32 = vadd.s32 1, %v1474_v24  ;;  %v443_v42 = vxor.u32 2147483648, %v442_v22  ;;  %v341_v31 = vsel %vm258_vm13, %v340_v51, %v339_v3  ;;  %vm1493_vm1 = vcmp.le.f32.partialorder %v359_v35, 0.7853982 }
  0xc8   :  { %v536_v61 = vshrl.u32 %v518_v54, %v534_v18  ;;  %v539_v25 = vadd.s32 127, %v538_v41  ;;  %v344_v16 = vsel %vm1483_vm15, %v1260_v19, %v341_v31  ;;  %vm464_vm2 = vcmp.lt.s32.totalorder %v1279_v50, 0 }
  0xc9   :  { %v624_v47 = vsel %vm622_vm12, %v623_v32, %v1474_v24  ;;  %v444_v53 = vsel %vm361_vm14, %v443_v42, %v442_v22  ;;  %vm1509_vm3 = vcmp.le.f32.partialorder %v462_v46, 0.7853982  ;;  %v342_v59 = vsub.s32 4, %v1368_v55 }
  0xca   :  { %v537_v14 = vor.u32 %v536_v61, %v535_v7  ;;  %v540_v15 = vshll.u32 %v539_v25, 23  ;;  %v625_v33 = vadd.s32 %v624_v47, %v620_v21  ;;  %v447_v35 = vsel %vm1493_vm1, %v1264_v38, %v444_v53 }
  0xcb   :  { %844 = vcosq.f32 %v344_v16  ;;  %v445_v60 = vsub.s32 4, %v1405_v63  ;;  %v343_v30 = vsel %vm258_vm13, %v342_v59, %v1368_v55  ;;  %v548_v10 = vsub.s32 4, %v1440_v2 }
  0xcc   :  { %v541_v48 = vor.u32 4788187, %v540_v15  ;;  %v544_v49 = vcvt.s32.f32 %v537_v14  ;;  %v626_v43 = vadd.s32 536870912, %v625_v33  ;;  %846 = vsinq.f32 %v344_v16 }
  0xcd   :  { %848 = vcosq.f32 %v447_v35  ;;  %v446_v57 = vsel %vm361_vm14, %v445_v60, %v1405_v63  ;;  %v345_v5 = vsel %vm1483_vm15, 0, %v343_v30  ;;  %v621_v39 = vadd.s32 %v1473_v23, %v1471_v37 }
  0xce   :  { %v542_v34 = vand.u32 2147483647, %v541_v48  ;;  %v1489_v40 = vshrl.u32 %v626_v43, 30  ;;  %850 = vsinq.f32 %v447_v35  ;;  %v448_v8 = vsel %vm1493_vm1, 0, %v446_v57 }
  0xcf   :  { %v349_v11 = vand.u32 3, %v345_v5  ;;  %v549_v7 = vsel %vm464_vm2, %v548_v10, %v1440_v2  ;;  %v452_v12 = vand.u32 3, %v448_v8  ;;  %vm348_vm11 = vweird.f32 %v1260_v19  ;;  %v862_v10 = vld [vmem:[#allocation2 + $0x10] sm:$0xff] }
  0xd0   :  { %v545_v45 = vmul.f32 %v544_v49, %v542_v34  ;;  %v628_v29 = vshll.u32 %v1489_v40, 30  ;;  %v551_v23 = vsel %vm1509_vm3, 0, %v549_v7  ;;  %vm567_vm14 = vcmp.lt.s32.totalorder %v1407_v0, 0 }
  0xd1   :  { %vm351_vm5 = vcmp.eq.s32.totalorder %v349_v11, 0  ;;  %vm354_vm6 = vcmp.eq.s32.totalorder %v349_v11, 2  ;;  %vm457_vm7 = vcmp.eq.s32.totalorder %v452_v12, 2  ;;  %vm454_vm8 = vcmp.eq.s32.totalorder %v452_v12, 0 }
  0xd2   :  { %v546_v27 = vxor.u32 2147483648, %v545_v45  ;;  %v629_v54 = vsub.s32 %v625_v33, %v628_v29  ;;  %v555_v22 = vand.u32 3, %v551_v23  ;;  %vm350_vm9 = vcmp.lt.s32.totalorder %v349_v11, 2 }
  0xd3   :  { %vm453_vm10 = vcmp.lt.s32.totalorder %v452_v12, 2  ;;  %vm1542_vm15 = vcmp.le.f32.partialorder %v565_v17, 0.7853982  ;;  %v651_v44 = vsub.s32 4, %v1489_v40  ;;  %vm451_vm1 = vweird.f32 %v1264_v38  ;;  %v863_v12 = vld [vmem:[#allocation2 + $0x18] sm:$0xff] }
  0xd4   :  { %v547_v56 = vsel %vm464_vm2, %v546_v27, %v545_v45  ;;  %v631_v36 = vsub.s32 0, %v629_v54  ;;  %vm557_vm12 = vcmp.eq.s32.totalorder %v555_v22, 0  ;;  %vm560_vm13 = vcmp.eq.s32.totalorder %v555_v22, 2 }
  0xd5   :  { %v550_v46 = vsel %vm1509_vm3, %v1279_v50, %v547_v56  ;;  %v845_v52 = vpop.eup %844  ;;  %vm556_vm2 = vcmp.lt.s32.totalorder %v555_v22, 2  ;;  %v652_v17 = vsel %vm567_vm14, %v651_v44, %v1489_v40  ;;  %vm554_vm3 = vweird.f32 %v1279_v50 }
  0xd6   :  { %v787_v6 = vmin.u32 %v631_v36, %v629_v54  ;;  %852 = vcosq.f32 %v550_v46  ;;  %v847_v18 = vpop.eup %846  ;;  %v355_v25 = vxor.u32 2147483648, %v845_v52  ;;  %v654_v38 = vsel %vm1542_vm15, 0, %v652_v17 }
  0xd7   :  { %854 = vsinq.f32 %v550_v46  ;;  %v849_v41 = vpop.eup %848  ;;  %v352_v61 = vxor.u32 2147483648, %v847_v18  ;;  %v658_v60 = vand.u32 3, %v654_v38 }
  0xd8   :  { %v633_v62 = vclz %v787_v6  ;;  %v851_v37 = vpop.eup %850  ;;  %v458_v3 = vxor.u32 2147483648, %v849_v41  ;;  %v356_v47 = vsel %vm354_vm6, %v355_v25, %v847_v18  ;;  %v860_v6 = vld [vmem:[#allocation2] sm:$0xff] }
  0xd9   :  { %v455_v15 = vxor.u32 2147483648, %v851_v37  ;;  %v353_v49 = vsel %vm351_vm5, %v845_v52, %v352_v61  ;;  %vm660_vm5 = vcmp.eq.s32.totalorder %v658_v60, 0  ;;  %vm659_vm6 = vcmp.lt.s32.totalorder %v658_v60, 2 }
  0xda   :  { %v788_v4 = vadd.s32 4294967294, %v633_v62  ;;  %v459_v51 = vsel %vm457_vm7, %v458_v3, %v851_v37  ;;  %v357_v43 = vsel %vm350_vm9, %v353_v49, %v356_v47  ;;  %v861_v62 = vld [vmem:[#allocation2 + $0x8] sm:$0xff]  ;;  %vm657_vm7 = vweird.f32 %v1407_v0 }
  0xdb   :  { %v456_v34 = vsel %vm454_vm8, %v849_v41, %v455_v15  ;;  %v358_v16 = vsel %vm348_vm11, nan, %v357_v43 }
  0xdc   :  { %vm789_vm4 = vcmp.lt.s32.totalorder %v788_v4, 0  ;;  %v460_v53 = vsel %vm453_vm10, %v456_v34, %v459_v51  ;;  %v668_v59 = vsub.f32 1.0, %v358_v16 }
  0xdd   :  { %v636_v55 = vsel %vm789_vm4, 0, %v788_v4  ;;  %v461_v35 = vsel %vm451_vm1, nan, %v460_v53  ;;  %vm663_vm4 = vcmp.eq.s32.totalorder %v658_v60, 2 }
  0xde   :  { %v637_v28 = vsub.s32 32, %v636_v55  ;;  %v638_v1 = vshll.u32 %v629_v54, %v636_v55  ;;  %v641_v63 = vsub.s32 4294967266, %v636_v55  ;;  %v669_v56 = vsub.f32 1.0, %v461_v35 }
  0xdf   :  { %v754_v46 = vmul.f32 %v860_v6, %v668_v59 }
  0xe0   :  { %v639_v20 = vshrl.u32 %v621_v39, %v637_v28  ;;  %v642_v24 = vadd.s32 127, %v641_v63  ;;  %v853_v14 = vpop.eup %852  ;;  %v755_v57 = vmul.f32 %v861_v62, %v669_v56 }
  0xe1   :  { %v855_v32 = vpop.eup %854  ;;  %v561_v42 = vxor.u32 2147483648, %v853_v14  ;;  %v758_v40 = vsel %vm122_vm0, %v754_v46, 0.0 }
  0xe2   :  { %v640_v26 = vor.u32 %v639_v20, %v638_v1  ;;  %v643_v13 = vshll.u32 %v642_v24, 23  ;;  %v558_v33 = vxor.u32 2147483648, %v855_v32  ;;  %v759_v8 = vsel %vm122_vm0, %v755_v57, 0.0  ;;  %v796_v24 = vld [vmem:[%s1572_s5 + $0x20] sm:$0xff] }
  0xe3   :  { %v562_v19 = vsel %vm560_vm13, %v561_v42, %v855_v32  ;;  %v760_v28 = vadd.f32 %v759_v8, %v758_v40 }
  0xe4   :  { %v644_v21 = vor.u32 4788187, %v643_v13  ;;  %v647_v2 = vcvt.s32.f32 %v640_v26  ;;  %v559_v27 = vsel %vm557_vm12, %v853_v14, %v558_v33 }
  0xe5   :  { %v563_v58 = vsel %vm556_vm2, %v559_v27, %v562_v19 }
  0xe6   :  { %v645_v48 = vand.u32 2147483647, %v644_v21  ;;  %v564_v36 = vsel %vm554_vm3, nan, %v563_v58 }
  0xe7   :  { %v670_v30 = vsub.f32 1.0, %v564_v36 }
  0xe8   :  { %v648_v45 = vmul.f32 %v647_v2, %v645_v48 }
  0xe9   :  { %v756_v39 = vmul.f32 %v862_v10, %v670_v30 }
  0xea   :  { %v649_v31 = vxor.u32 2147483648, %v648_v45 }
  0xeb   :  { %v761_v63 = vsel %vm122_vm0, %v756_v39, 0.0 }
  0xec   :  { %v650_v29 = vsel %vm567_vm14, %v649_v31, %v648_v45  ;;  %v762_v41 = vadd.f32 %v761_v63, %v760_v28 }
  0xed   :  { %v653_v54 = vsel %vm1542_vm15, %v1407_v0, %v650_v29 }
  0xee   :  { %856 = vcosq.f32 %v653_v54 }
  0xef   :  { %858 = vsinq.f32 %v653_v54 }
  0xf8   :  { %v857_v4 = vpop.eup %856 }
  0xf9   :  { %v859_v5 = vpop.eup %858  ;;  %v664_v50 = vxor.u32 2147483648, %v857_v4 }
  0xfa   :  { %v661_v55 = vxor.u32 2147483648, %v859_v5 }
  0xfb   :  { %v665_v52 = vsel %vm663_vm4, %v664_v50, %v859_v5 }
  0xfc   :  { %v662_v11 = vsel %vm660_vm5, %v857_v4, %v661_v55 }
  0xfd   :  { %v666_v1 = vsel %vm659_vm6, %v662_v11, %v665_v52 }
  0xfe   :  { %v667_v18 = vsel %vm657_vm7, nan, %v666_v1 }
  0xff   :  { %v671_v7 = vsub.f32 1.0, %v667_v18 }
 0x101   :  { %v757_v20 = vmul.f32 %v863_v12, %v671_v7 }
 0x103   :  { %v763_v37 = vsel %vm122_vm0, %v757_v20, 0.0 }
 0x104   :  { %v764_v23 = vadd.f32 %v763_v37, %v762_v41 }
 0x106   :  { %v765_v26 = vadd.f32 %v796_v24, %v764_v23 }
 0x108   :  { %797 = vst.msk [vmem:[%s1572_s5 + $0x20] sm:$0xff] %vm122_vm0, %v765_v26 }
 0x109   :  { %771 = vsyncpa [#allocation3], 1 }
 0x10a   :  { %772 = vsyncpa [#allocation5], 1 }
 0x10b   :  { %773 = vsyncpa [#allocation8], 1 }

</bundles_post_ra>
